<compile_context>
chip_gen: v7x
topology: tpu7x:2x2x1
jax: 0.10.0
libtpu: 0.0.40
codegen_flags: <defaults>
</compile_context>

<pallas_src>
import jax
import jax.numpy as jnp
from jax.experimental import pallas as pl
from jax.experimental.pallas import tpu as pltpu

HIDDEN_SIZE = 256   # Memory() default hidden_size
NUM_LAYERS = 1      # Memory() default num_layers


def _sigmoid(x):
    # sigmoid(x) = (1 + tanh(x/2)) / 2  -> one EUP op per element (vs exp + divide).
    return 0.5 * jnp.tanh(0.5 * x) + 0.5


# ------------------------------------------------------------- input-projection kernel
def _proj_kernel(x_ref, wih_ref, b_ref, gx_ref):
    """gates_x[t, batch-tile] = x_t @ W_ih^T + (b_ih + b_hh). Fully time-parallel."""
    gx_ref[...] = (
        jnp.dot(x_ref[...], wih_ref[...], preferred_element_type=jnp.float32)
        + b_ref[...]
    ).astype(gx_ref.dtype)


def _project_inputs(x_bf16, w_ih_t, bias, TB):
    """x_bf16: [T, B_pad, I] bf16 -> gates_x: [T, B_pad, 4H] f32.

    This GEMM sits off the serial recurrence chain, so its small K (= input_size)
    does not matter for the recurrent critical path. gates_x is f32 for accuracy;
    on v5e consider bf16 here to halve the dominant HBM stream.
    """
    T, B_pad, I = x_bf16.shape
    G = w_ih_t.shape[-1]                      # 4*H
    grid = (T, B_pad // TB)

    cost = pl.CostEstimate(
        flops=int(2 * T * B_pad * I * G),
        transcendentals=0,
        bytes_accessed=int(x_bf16.size * 2 + w_ih_t.size * 2 + bias.size * 4
                           + T * B_pad * G * 4))

    return pl.pallas_call(
        _proj_kernel,
        out_shape=jax.ShapeDtypeStruct((T, B_pad, G), jnp.float32),
        grid_spec=pltpu.PrefetchScalarGridSpec(
            num_scalar_prefetch=0,
            grid=grid,
            in_specs=[
                pl.BlockSpec((None, TB, I), lambda t, b: (t, b, 0)),  # x_t (time squeezed)
                pl.BlockSpec((I, G), lambda t, b: (0, 0)),            # W_ih^T (VMEM-resident)
                pl.BlockSpec((1, G), lambda t, b: (0, 0)),            # bias
            ],
            out_specs=pl.BlockSpec((None, TB, G), lambda t, b: (t, b, 0)),
        ),
        compiler_params=pltpu.CompilerParams(
            dimension_semantics=("parallel", "parallel")),
        cost_estimate=cost,
    )(x_bf16, w_ih_t, bias)


# ------------------------------------------------------------------ recurrent kernel
def _lstm_recurrent_kernel(gx_ref, h0_ref, c0_ref, whh_ref,
                           out_ref, hn_ref, cn_ref, h_sc, c_sc):
    """One (batch-tile, timestep) grid point of the serial LSTM recurrence."""
    t = pl.program_id(1)

    @pl.when(t == 0)
    def _():
        h_sc[...] = h0_ref[...].astype(h_sc.dtype)   # bf16 carry (MXU operand dtype)
        c_sc[...] = c0_ref[...]                       # f32 carry

    H = c_sc.shape[-1]

    # Single per-step MXU dot (K = H = 256); x projection was hoisted off this chain.
    gates = gx_ref[...] + jnp.dot(h_sc[...], whh_ref[...],
                                  preferred_element_type=jnp.float32)

    # Gate order matches torch.nn.LSTM: i, f, g, o. Slices are 128-lane aligned.
    i_g = _sigmoid(gates[:, 0 * H:1 * H])
    f_g = _sigmoid(gates[:, 1 * H:2 * H])
    g_g = jnp.tanh(gates[:, 2 * H:3 * H])
    o_g = _sigmoid(gates[:, 3 * H:4 * H])

    c_new = f_g * c_sc[...] + i_g * g_g
    h_new = o_g * jnp.tanh(c_new)

    c_sc[...] = c_new
    h_sc[...] = h_new.astype(h_sc.dtype)
    out_ref[...] = h_new.astype(out_ref.dtype)

    # hn/cn blocks are t-invariant; only the last-timestep value reaches HBM, so skip
    # the redundant per-step stores.
    @pl.when(t == pl.num_programs(1) - 1)
    def _():
        hn_ref[...] = h_new.astype(hn_ref.dtype)
        cn_ref[...] = c_new.astype(cn_ref.dtype)


# ----------------------------------------------------------------------------- wrapper
def _pick_batch_tiling(B, batch_tile):
    """Pick (TB, B_pad): TB a multiple of 8 (or == B for tiny B); prefer >= 2 tiles
    along the 'parallel' axis so v7x megacore's second TensorCore gets work."""
    if B <= 8:
        return B, B
    half = -(-B // 2)                               # ceil(B/2)
    TB = min(batch_tile, ((half + 7) // 8) * 8)     # multiple of 8 sublanes
    B_pad = pl.cdiv(B, TB) * TB
    return TB, B_pad


def _run_lstm(x_seq, h0, c0, w_ih_t, w_hh_t, bias, *, batch_tile=1024):
    """x_seq: [T, B, I] f32; h0/c0: [B, H] f32. Returns (out [T,B,H], h_n, c_n)."""
    T, B, I = x_seq.shape
    H = h0.shape[-1]
    G = 4 * H

    TB, B_pad = _pick_batch_tiling(B, batch_tile)

    x_bf16 = x_seq.astype(jnp.bfloat16)
    if B_pad != B:
        x_bf16 = jnp.pad(x_bf16, ((0, 0), (0, B_pad - B), (0, 0)))
        h0 = jnp.pad(h0, ((0, B_pad - B), (0, 0)))
        c0 = jnp.pad(c0, ((0, B_pad - B), (0, 0)))

    # Time-parallel input projection (hoisted off the serial recurrence).
    gates_x = _project_inputs(x_bf16, w_ih_t, bias, TB)

    grid = (B_pad // TB, T)

    cost = pl.CostEstimate(
        flops=int(2 * T * B_pad * H * G),
        transcendentals=int(5 * T * B_pad * H),
        bytes_accessed=int(gates_x.size * 4 + w_hh_t.size * 2
                           + (T * B_pad * H + 4 * B_pad * H) * 4))

    out, h_n, c_n = pl.pallas_call(
        _lstm_recurrent_kernel,
        out_shape=(
            jax.ShapeDtypeStruct((T, B_pad, H), jnp.float32),
            jax.ShapeDtypeStruct((B_pad, H), jnp.float32),
            jax.ShapeDtypeStruct((B_pad, H), jnp.float32),
        ),
        grid_spec=pltpu.PrefetchScalarGridSpec(
            num_scalar_prefetch=0,
            grid=grid,
            in_specs=[
                pl.BlockSpec((None, TB, G), lambda b, t: (t, b, 0)),  # gates_x (time squeezed)
                pl.BlockSpec((TB, H), lambda b, t: (b, 0)),           # h0
                pl.BlockSpec((TB, H), lambda b, t: (b, 0)),           # c0
                pl.BlockSpec((H, G), lambda b, t: (0, 0)),            # W_hh^T (VMEM-resident)
            ],
            out_specs=(
                pl.BlockSpec((None, TB, H), lambda b, t: (t, b, 0)),  # out sequence
                pl.BlockSpec((TB, H), lambda b, t: (b, 0)),           # h_n
                pl.BlockSpec((TB, H), lambda b, t: (b, 0)),           # c_n
            ),
            scratch_shapes=[
                pltpu.VMEM((TB, H), jnp.bfloat16),   # h carry (next-step MXU operand)
                pltpu.VMEM((TB, H), jnp.float32),    # c carry
            ],
        ),
        compiler_params=pltpu.CompilerParams(
            dimension_semantics=("parallel", "arbitrary")),
        cost_estimate=cost,
    )(gates_x, h0, c0, w_hh_t)

    if B_pad != B:
        out, h_n, c_n = out[:, :B, :], h_n[:B], c_n[:B]
    return out, h_n, c_n


def init_memory_params(key, input_size, hidden_size=HIDDEN_SIZE):
    """torch.nn.LSTM-style uniform(-1/sqrt(H), 1/sqrt(H)) init.

    Weights are stored transposed ([in, 4H]) and in bf16 so the kernels compute
    x @ W on the MXU with f32 accumulation; the two biases are pre-summed (f32).
    """
    bound = 1.0 / float(jnp.sqrt(jnp.float32(hidden_size)))
    k1, k2, k3, k4 = jax.random.split(key, 4)
    w_ih = jax.random.uniform(k1, (4 * hidden_size, input_size), jnp.float32, -bound, bound)
    w_hh = jax.random.uniform(k2, (4 * hidden_size, hidden_size), jnp.float32, -bound, bound)
    b_ih = jax.random.uniform(k3, (4 * hidden_size,), jnp.float32, -bound, bound)
    b_hh = jax.random.uniform(k4, (4 * hidden_size,), jnp.float32, -bound, bound)
    return {
        "w_ih_t": w_ih.T.astype(jnp.bfloat16),        # [I, 4H]
        "w_hh_t": w_hh.T.astype(jnp.bfloat16),        # [H, 4H]
        "bias": (b_ih + b_hh).reshape(1, -1),         # [1, 4H] f32
    }


def memory_forward(params, inputs, masks=None, hidden_states=None, *, batch_tile=1024):
    """Pallas equivalent of Memory.forward (type='lstm', num_layers=1).

    inputs: [T, B, input_size] (batch mode) or [B, input_size] (inference step).
    hidden_states: optional (h, c), each [num_layers, B, H] or [B, H].
    Returns (out, (h_n, c_n)); the caller carries the state (JAX is functional).
    """
    batch_mode = masks is not None
    if batch_mode and hidden_states is None:
        raise ValueError("Hidden states not passed to memory module during policy update")

    x = inputs if inputs.ndim == 3 else inputs[None]   # .unsqueeze(0) for inference
    T, B, _ = x.shape
    H = params["w_hh_t"].shape[0]

    if hidden_states is None:
        h0 = jnp.zeros((B, H), jnp.float32)
        c0 = jnp.zeros((B, H), jnp.float32)
    else:
        h0, c0 = hidden_states
        h0 = jnp.asarray(h0, jnp.float32).reshape(B, H)
        c0 = jnp.asarray(c0, jnp.float32).reshape(B, H)

    out, h_n, c_n = _run_lstm(x, h0, c0, params["w_ih_t"], params["w_hh_t"],
                              params["bias"], batch_tile=batch_tile)

    if batch_mode:
        # TODO(synk): unpad_trajectories(out, masks) is defined outside this module;
        # returning the padded sequence output unchanged.
        return out, (h_n[None], c_n[None])
    return out, (h_n[None], c_n[None])


# ----------------------------------------------------------------------------- reference
def _ref_lstm(x_seq, h0, c0, params):
    """Pure-JAX f32 LSTM reference (torch.nn.LSTM semantics, gate order i,f,g,o).

    Mirrors the kernel's quantization: bf16 x / weights, bf16 h fed to W_hh, f32 math.
    """
    w_ih_t = params["w_ih_t"].astype(jnp.float32)
    w_hh_t = params["w_hh_t"].astype(jnp.float32)
    bias = params["bias"].astype(jnp.float32)
    H = w_hh_t.shape[0]

    def step(carry, x_t):
        h, c = carry
        h_q = h.astype(jnp.bfloat16).astype(jnp.float32)
        gates = x_t @ w_ih_t + h_q @ w_hh_t + bias
        i = jax.nn.sigmoid(gates[:, 0 * H:1 * H])
        f = jax.nn.sigmoid(gates[:, 1 * H:2 * H])
        g = jnp.tanh(gates[:, 2 * H:3 * H])
        o = jax.nn.sigmoid(gates[:, 3 * H:4 * H])
        c = f * c + i * g
        h = o * jnp.tanh(c)
        return (h, c), h

    (h_n, c_n), out = jax.lax.scan(step, (h0, c0), x_seq)
    return out, h_n, c_n


if __name__ == "__main__":
    key = jax.random.PRNGKey(0)
    k_x, k_p = jax.random.split(key)

    T, B, INPUT_SIZE = 8, 4, 64
    params = init_memory_params(k_p, INPUT_SIZE, HIDDEN_SIZE)
    x = jax.random.normal(k_x, (T, B, INPUT_SIZE), jnp.float32)

    # Trajectory rollout (zero initial state), like the policy-update path.
    out, (h_n, c_n) = memory_forward(params, x)
    out = jax.block_until_ready(out)
    assert out.shape == (T, B, HIDDEN_SIZE)

    # Reference: same bf16-quantized inputs/weights, f32 math throughout.
    x_q = x.astype(jnp.bfloat16).astype(jnp.float32)
    zeros = jnp.zeros((B, HIDDEN_SIZE), jnp.float32)
    ref_out, ref_h, ref_c = _ref_lstm(x_q, zeros, zeros, params)

    err_o = float(jnp.max(jnp.abs(out - ref_out)))
    err_h = float(jnp.max(jnp.abs(h_n[0] - ref_h)))
    err_c = float(jnp.max(jnp.abs(c_n[0] - ref_c)))
    assert jnp.allclose(out, ref_out, atol=2e-2, rtol=2e-2), f"out max abs err {err_o}"
    assert jnp.allclose(h_n[0], ref_h, atol=2e-2, rtol=2e-2), f"h_n max abs err {err_h}"
    assert jnp.allclose(c_n[0], ref_c, atol=2e-2, rtol=2e-2), f"c_n max abs err {err_c}"

    # Inference path: Memory.forward(input) with a carried hidden state ([B, I] step).
    step_out, _ = memory_forward(params, x[0], hidden_states=(h_n, c_n))
    step_out = jax.block_until_ready(step_out)
    assert step_out.shape == (1, B, HIDDEN_SIZE)

    # A larger-batch run to exercise the multi-tile ("parallel" axis >= 2) path.
    B_big = 48
    x_big = jax.random.normal(k_x, (T, B_big, INPUT_SIZE), jnp.float32)
    out_big, (h_big, c_big) = memory_forward(params, x_big, batch_tile=16)
    out_big = jax.block_until_ready(out_big)
    x_big_q = x_big.astype(jnp.bfloat16).astype(jnp.float32)
    zeros_big = jnp.zeros((B_big, HIDDEN_SIZE), jnp.float32)
    ref_out_big, ref_h_big, ref_c_big = _ref_lstm(x_big_q, zeros_big, zeros_big, params)
    assert jnp.allclose(out_big, ref_out_big, atol=2e-2, rtol=2e-2)
    assert jnp.allclose(h_big[0], ref_h_big, atol=2e-2, rtol=2e-2)
    assert jnp.allclose(c_big[0], ref_c_big, atol=2e-2, rtol=2e-2)

    print("KERNEL_OK")
</pallas_src>

<mosaic_0001>
module attributes {stable_mosaic.version = 11 : i64} {
  func.func @_proj_kernel(%arg0: i32, %arg1: i32, %arg2: memref<1x4x64xbf16, #tpu.memory_space<vmem>>, %arg3: memref<64x1024xbf16, #tpu.memory_space<vmem>>, %arg4: memref<1x1024xf32, #tpu.memory_space<vmem>>, %arg5: memref<1x4x1024xf32, #tpu.memory_space<vmem>>) attributes {dimension_semantics = [#tpu.dimension_semantics<parallel>, #tpu.dimension_semantics<parallel>], iteration_bounds = array<i64: 8, 1>, scalar_prefetch = 0 : i64, scratch_operands = 0 : i64, tpu.core_type = #tpu.core_type<tc>, window_params = [{transform_indices = @transform_0, window_bounds = array<i64: 1, 4, 64>}, {pipeline_mode = #tpu.pipeline_mode<synchronous>, transform_indices = @transform_1, window_bounds = array<i64: 64, 1024>}, {pipeline_mode = #tpu.pipeline_mode<synchronous>, transform_indices = @transform_2, window_bounds = array<i64: 1, 1024>}, {transform_indices = @transform_3, window_bounds = array<i64: 1, 4, 1024>}]} {
    %c0 = arith.constant 0 : index
    %c0_0 = arith.constant 0 : index
    %c0_1 = arith.constant 0 : index
    %0 = vector.load %arg2[%c0, %c0_0, %c0_1] : memref<1x4x64xbf16, #tpu.memory_space<vmem>>, vector<1x4x64xbf16>
    %1 = vector.shape_cast %0 : vector<1x4x64xbf16> to vector<4x64xbf16>
    %c0_2 = arith.constant 0 : index
    %c0_3 = arith.constant 0 : index
    %2 = vector.load %arg3[%c0_2, %c0_3] : memref<64x1024xbf16, #tpu.memory_space<vmem>>, vector<64x1024xbf16>
    %cst = arith.constant dense<0.000000e+00> : vector<4x1024xf32>
    %3 = tpu.matmul %1, %2, %cst {dimension_numbers = #tpu.dot_dimension_numbers<[1], [0], [0], [1], [0, 0, 1, 1], [], []>} : vector<4x64xbf16>, vector<64x1024xbf16>, vector<4x1024xf32> -> vector<4x1024xf32>
    %c0_4 = arith.constant 0 : index
    %c0_5 = arith.constant 0 : index
    %4 = vector.load %arg4[%c0_4, %c0_5] : memref<1x1024xf32, #tpu.memory_space<vmem>>, vector<1x1024xf32>
    %5 = vector.broadcast %4 : vector<1x1024xf32> to vector<4x1024xf32>
    %6 = arith.addf %3, %5 : vector<4x1024xf32>
    %c0_6 = arith.constant 0 : index
    %c0_7 = arith.constant 0 : index
    %c0_8 = arith.constant 0 : index
    %7 = vector.load %arg5[%c0_6, %c0_7, %c0_8] : memref<1x4x1024xf32, #tpu.memory_space<vmem>>, vector<1x4x1024xf32>
    %8 = vector.shape_cast %7 : vector<1x4x1024xf32> to vector<4x1024xf32>
    %9 = vector.shape_cast %6 : vector<4x1024xf32> to vector<1x4x1024xf32>
    tpu.vector_store %arg5[%c0_6, %c0_7, %c0_8], %9 {strides = array<i32>} : memref<1x4x1024xf32, #tpu.memory_space<vmem>>, vector<1x4x1024xf32>,
    return
  }
  func.func @transform_0(%arg0: i32, %arg1: i32) -> (i32, i32, i32) {
    %c0_i32 = arith.constant 0 : i32
    %c0_i32_0 = arith.constant 0 : i32
    return %arg0, %arg1, %c0_i32 : i32, i32, i32
  }
  func.func @transform_1(%arg0: i32, %arg1: i32) -> (i32, i32) {
    %c0_i32 = arith.constant 0 : i32
    %c0_i32_0 = arith.constant 0 : i32
    %c0_i32_1 = arith.constant 0 : i32
    return %c0_i32, %c0_i32_0 : i32, i32
  }
  func.func @transform_2(%arg0: i32, %arg1: i32) -> (i32, i32) {
    %c0_i32 = arith.constant 0 : i32
    %c0_i32_0 = arith.constant 0 : i32
    %c0_i32_1 = arith.constant 0 : i32
    return %c0_i32, %c0_i32_0 : i32, i32
  }
  func.func @transform_3(%arg0: i32, %arg1: i32) -> (i32, i32, i32) {
    %c0_i32 = arith.constant 0 : i32
    %c0_i32_0 = arith.constant 0 : i32
    return %arg0, %arg1, %c0_i32 : i32, i32, i32
  }
}

</mosaic_0001>

<bundles_post_ra>
// kernel: tpu_custom_call.1
= control target key start
LH: loop header
LB: loop body
LE: loop exit
PB: predicated region body
PF: predicated region fallthrough
CT: control target
= control target key end

     0   :  { %8 = vsyncpa [#allocation3], 0  ;;  %s1367_s0 = inlined_call_operand.hbm [shape: bf16[8,4,64], index: 0, kind: input, shape index: {}]   ;;  %s1368_s1 = inlined_call_operand.hbm [shape: bf16[64,1024], index: 1, kind: input, shape index: {}]   ;;  %s1369_s2 = inlined_call_operand.hbm [shape: f32[1,1024], index: 2, kind: input, shape index: {}]   ;;  %s1370_s3 = inlined_call_operand.hbm [shape: f32[8,4,1024], index: 3, kind: output, shape index: {}]  }
   0x1   :  { %10 = vsyncpa [#allocation3 + $0x1], 0 }
   0x2   :  { %11 = vsyncpa [#allocation6], 0 }
   0x3   :  { %12 = vsyncpa [#allocation4], 0 }
   0x4   :  { %14 = vsyncpa [#allocation4 + $0x1], 0  ;;  %s1114_s12 = smov 0   ;;  %s1116_s13 = smov 0  }
   0x5   :  { %s1118_s14 = smov 0   ;;  %s1120_s15 = smov 0  }
   0x6   :  { %s1122_s16 = smov 0   ;;  %s1124_s17 = smov 0  }
   0x7 LB: > { %s772_s18 = sadd.s32 4294967295, %s1085_s17   ;;  %s773_s19 = sadd.s32 4294967294, %s1085_s17   ;;  %s1085_s17 = sphi %s1124_s17, %s20_s17   ;;  %s1081_s16 = sphi %s1122_s16, %s1392_s16   ;;  %s1077_s15 = sphi %s1120_s15, %s1391_s15   ;;  %s1073_s14 = sphi %s1118_s14, %s1390_s14   ;;  %s1069_s13 = sphi %s1116_s13, %s1389_s13   ;;  %s1065_s12 = sphi %s1114_s12, %s1388_s12  }
   0x8   : > { %p54_p0 = scmp.ne.s32.totalorder %s1069_s13, %s1065_s12  ;;  %p1148_p1 = scmp.eq.s32.totalorder %s772_s18, 0 }
   0x9   : > { %p1152_p2 = scmp.eq.s32.totalorder %s772_s18, 7  ;;  %p128_p3 = scmp.eq.s32.totalorder %s773_s19, 7 }
   0xa   : > { %s1375_s20 = scalar_select %p1148_p1, 1, 0 }
   0xb   : > { %s1376_s21 = scalar_select %p1152_p2, 1, 0 }
   0xc   : > { %p1158_p4 = por %p1148_p1, %p54_p0  ;;  %p774_p5 = scmp.ge.s32.totalorder %s1085_s17, 1 }
   0xd   : > { %p1163_p6 = por %p128_p3, %p54_p0  ;;  %p135_p7 = scmp.lt.s32.totalorder %s1085_s17, 9 }
   0xe   : > { %s1377_s22 = scalar_select %p1158_p4, 1, 0 }
   0xf   : > { %s1378_s23 = scalar_select %p1163_p6, 1, 0 }
  0x10   : > { %p1168_p8 = pnand %p774_p5, %p135_p7  ;;  %s1087_s25 = smov [#allocation5]  }
  0x11   : > { %s147_s26 = sshll.u32 %s1087_s25, 4  ;;  %s1088_s28 = smov [#allocation7]   ;;  %s148_s26 = int_to_ptr.vmem [resolvable:$true] %s147_s26 }
  0x12   : > { %s1379_s24 = scalar_select %p1168_p8, 1, 0 }
  0x13   : > { %p839_p9 = pneg %p1168_p8  ;;  %s161_s29 = sshll.u32 %s1088_s28, 4  ;;  %s1180_s29 = int_to_ptr.vmem [resolvable:$true] %s161_s29 }
  0x14   : > { %s913_s5 = scalar_lea.hbm %s1368_s1, 4096 }
  0x15   : > { %p1176_p10 = pnand %p839_p9, %p1148_p1  ;;  %p914_p11 = scmp.ne.s32.totalorder %s1368_s1, %s913_s5 }
  0x16   : > { %p920_p3 = scmp.lt.u32.totalorder %s913_s5, %s1368_s1 }
  0x17   : > { %p915_p12 = pneg %p1176_p10 }
  0x19   : > { %p916_p13 = pnand %p915_p12, %p914_p11 }
  0x1b   : > { %p917_p0 = pneg %p916_p13 }
  0x1d   : > { %p922_p5 = pnand %p920_p3, %p917_p0 }
  0x1f   : > { %925 = shalt.err (!%p922_p5)
}
  0x20   : > { %s926_s10 = scalar_lea.vmem %s148_s26, 4096  ;;  %p934_p1 = scmp.lt.s32.totalorder %s148_s26, %s148_s26 }
  0x21   : > { %p927_p7 = scmp.ne.s32.totalorder %s148_s26, %s926_s10  ;;  %p935_p4 = scmp.lt.s32.totalorder %s926_s10, %s926_s10 }
  0x23   : > { %p929_p9 = pnand %p927_p7, %p915_p12  ;;  %p936_p8 = por %p935_p4, %p934_p1 }
  0x25   : > { %p930_p6 = pneg %p929_p9 }
  0x27   : > { %p937_p2 = pnand %p936_p8, %p930_p6 }
  0x29   : > { %940 = shalt.err (!%p937_p2)
}
  0x2a   : > { %s1089_s11 = smov 512   ;;  %s1090_s18 = smov 32  }
  0x2b   : > { %842 = dma.hbm_to_vmem [thread:$0]  (!%p1176_p10), %s1368_s1, 4096, %s148_s26, [#allocation6], %s1089_s11, %s1089_s11, %s1090_s18  }
  0x2c   : > { %s941_s4 = scalar_lea.hbm %s1369_s2, 128 }
  0x2d   : > { %p942_p11 = scmp.ne.s32.totalorder %s1369_s2, %s941_s4  ;;  %p948_p4 = scmp.lt.u32.totalorder %s941_s4, %s1369_s2 }
  0x2f   : > { %p944_p1 = pnand %p942_p11, %p915_p12 }
  0x31   : > { %p945_p2 = pneg %p944_p1 }
  0x33   : > { %p950_p6 = pnand %p948_p4, %p945_p2 }
  0x35   : > { %953 = shalt.err (!%p950_p6)
}
  0x36   : > { %s954_s26 = scalar_lea.vmem %s1180_s29, 128  ;;  %p962_p3 = scmp.lt.s32.totalorder %s1180_s29, %s1180_s29 }
  0x37   : > { %p955_p8 = scmp.ne.s32.totalorder %s1180_s29, %s954_s26  ;;  %p963_p5 = scmp.lt.s32.totalorder %s954_s26, %s954_s26 }
  0x39   : > { %p957_p13 = pnand %p955_p8, %p915_p12  ;;  %p964_p7 = por %p963_p5, %p962_p3 }
  0x3b   : > { %p958_p0 = pneg %p957_p13 }
  0x3d   : > { %p965_p9 = pnand %p964_p7, %p958_p0 }
  0x3f   : > { %968 = shalt.err (!%p965_p9)
}
  0x40   : > { %845 = dma.hbm_to_vmem [thread:$0]  (!%p1176_p10), %s1369_s2, 128, %s1180_s29, [#allocation6]  }
  0x41   : > { %s32_s11 = sadd.s32 1, %s1081_s16  ;;  %s41_s18 = sadd.s32 1, %s1073_s14 }
  0x42   : > { %p34_p12 = scmp.ge.s32.totalorder %s32_s11, 8  ;;  %p48_p11 = scmp.ne.s32.totalorder %s1073_s14, %s1069_s13 }
  0x43   : > { %p49_p1 = scmp.eq.s32.totalorder %s1085_s17, 0  ;;  %p856_p2 = scmp.lt.s32.totalorder %s1085_s17, 8 }
  0x44   : > { %s1394_s11 = smov (%p34_p12, %s32_s11), 0  ;;  %p1381_p6 = scmp.ne.s32.totalorder %s1376_s21, 0 }
  0x45   : > { %p50_p4 = por %p49_p1, %p48_p11  ;;  %s36_s19 = ssub.s32 %s1081_s16, %s1394_s11 }
  0x46   : > { %p1239_p8 = por %p1381_p6, %p48_p11  ;;  %s172_s25 = sand.u32 1, %s1073_s14  }
  0x47   : > { %p39_p13 = scmp.eq.s32.totalorder %s36_s19, 0  ;;  %s778_s29 = sshll.u32 %s172_s25, 1 }
  0x48   : > { %s779_s28 = sshll.u32 %s1081_s16, 5  ;;  %s176_s21 = scalar_lea.vmem [#allocation2], %s778_s29 }
  0x49   : > { %s1248_s30 = scalar_select %p39_p13, %s1073_s14, %s41_s18  }
  0x4a   : > { %s1253_s6 = scalar_lea.hbm %s1367_s0, %s779_s28  ;;  %s184_s7 = sshll.u32 %s176_s21, 4  ;;  %s1261_s7 = int_to_ptr.vmem [resolvable:$true] %s184_s7 }
  0x4b   : > { %p1257_p10 = pnand %p856_p2, %p50_p4  ;;  %s173_s26 = scalar_lea.sflag [#allocation3], %s172_s25 }
  0x4c   : > { %s969_s9 = scalar_lea.hbm %s1253_s6, 32  ;;  %s974_s19 = scalar_lea.hbm %s1367_s0, 256 }
  0x4d   : > { %p970_p0 = scmp.ne.s32.totalorder %s1253_s6, %s969_s9  ;;  %p971_p3 = pneg %p1257_p10 }
  0x4e   : > { %p975_p9 = scmp.lt.u32.totalorder %s1253_s6, %s1367_s0  ;;  %p976_p12 = scmp.lt.u32.totalorder %s974_s19, %s969_s9 }
  0x4f   : > { %p972_p5 = pnand %p971_p3, %p970_p0  ;;  %p978_p1 = scmp.lt.u32.totalorder %s969_s9, %s1253_s6 }
  0x50   : > { %p977_p11 = por %p976_p12, %p975_p9 }
  0x51   : > { %p973_p7 = pneg %p972_p5 }
  0x52   : > { %p979_p2 = por %p978_p1, %p977_p11 }
  0x54   : > { %p980_p4 = pnand %p979_p2, %p973_p7 }
  0x56   : > { %983 = shalt.err (!%p980_p4)
}
  0x57   : > { %s984_s25 = scalar_lea.vmem %s1261_s7, 32  ;;  %s1091_s4 = smov [#allocation2]  }
  0x58   : > { %p985_p6 = scmp.ne.s32.totalorder %s1261_s7, %s984_s25  ;;  %s989_s5 = sshll.u32 %s1091_s4, 4  ;;  %s990_s5 = int_to_ptr.vmem [resolvable:$false] %s989_s5 }
  0x59   : > { %s991_s21 = scalar_lea.vmem %s990_s5, 64  ;;  %p992_p5 = scmp.lt.s32.totalorder %s1261_s7, %s990_s5 }
  0x5a   : > { %p987_p13 = pnand %p985_p6, %p971_p3  ;;  %p993_p9 = scmp.lt.s32.totalorder %s991_s21, %s984_s25 }
  0x5c   : > { %p988_p0 = pneg %p987_p13  ;;  %p994_p12 = por %p993_p9, %p992_p5 }
  0x5e   : > { %p995_p11 = pnand %p994_p12, %p988_p0 }
  0x60   : > { %998 = shalt.err (!%p995_p11)
}
  0x61   : > { %849 = dma.hbm_to_vmem [thread:$0]  (!%p1257_p10), %s1253_s6, 32, %s1261_s7, %s173_s26  }
  0x62   : > { %p1384_p7 = scmp.ne.s32.totalorder %s1379_s24, 0 }
  0x63   : > { %s1291_s9 = sand.u32 (!%p1384_p7), 1, %s1069_s13   ;;  %p1385_p3 = scmp.ne.s32.totalorder (!%p1384_p7), %s1377_s22, 0 }
  0x64   : > { %193 = sbr.rel (%p1384_p7) target bundleno = 378 (0x17a), region = 32  ;;  %s781_s10 = sshll.u32 (!%p1384_p7), %s1291_s9, 1 }
  0x65   : > { %s196_s18 = scalar_lea.sflag (!%p1384_p7), [#allocation3], %s1291_s9  ;;  %s1295_s19 = scalar_lea.vmem (!%p1384_p7), [#allocation2], %s781_s10 }
  0x6b   : > { %1052 = dma.done.wait (%p1385_p3), %s196_s18, 32  }
  0x6c   : > { %1054 = vsyncadd (%p1385_p3), %s196_s18, 4294967264  ;;  %p1386_p10 = scmp.ne.s32.totalorder %s1375_s20, 0 }
  0x6e   : > { %1056 = dma.done.wait (%p1386_p10), [#allocation6], 4224  }
  0x6f   : > { %1058 = vsyncadd (%p1386_p10), [#allocation6], 4294963072  ;;  %v1092_v0 = vmov 0   ;;  %v232_v1 = vld [vmem:[#allocation5] sm:$0xff]  ;;  %v233_v3 = vld [vmem:[#allocation5 + $0x8] sm:$0xff]  ;;  %vm466_vm0 = vcmask 523264  }
  0x70   : > { %502 = vmatprep.mubr.bf16.mxu0 %v1092_v0  ;;  %543 = vmatprep.mubr.bf16.mxu1 %v1092_v0  ;;  %v236_v2 = vld [vmem:[#allocation5 + $0x20] sm:$0xff]  ;;  %v237_v5 = vld [vmem:[#allocation5 + $0x28] sm:$0xff]  ;;  %v234_v31 = vld [vmem:[#allocation5 + $0x10] sm:$0xff]  ;;  %s784_s20 = sshll.u32 %s1291_s9, 5  ;;  %s826_s24 = sshll.u32 %s1077_s15, 9 }
  0x71   : > { %v786_v4 = vcombine.high %v232_v1, %v236_v2  ;;  %v785_v6 = vcombine.low %v232_v1, %v236_v2  ;;  %v240_v7 = vld [vmem:[#allocation5 + $0x40] sm:$0xff]  ;;  %v788_v9 = vcombine.high %v233_v3, %v237_v5  ;;  %v787_v10 = vcombine.low %v233_v3, %v237_v5  ;;  %v241_v12 = vld [vmem:[#allocation5 + $0x48] sm:$0xff]  ;;  %v238_v32 = vld [vmem:[#allocation5 + $0x30] sm:$0xff]  ;;  %s229_s22 = scalar_lea.vmem [#allocation8], %s784_s20  ;;  %s1319_s26 = scalar_lea.hbm %s1370_s3, %s826_s24 }
  0x72   : > { %v244_v8 = vld [vmem:[#allocation5 + $0x60] sm:$0xff]  ;;  %v245_v13 = vld [vmem:[#allocation5 + $0x68] sm:$0xff]  ;;  %v235_v33 = vld [vmem:[#allocation5 + $0x18] sm:$0xff]  ;;  %v790_v37 = vcombine.high %v234_v31, %v238_v32  ;;  %v789_v44 = vcombine.low %v234_v31, %v238_v32  ;;  %s671_s6 = sshll.u32 %s229_s22, 4  ;;  %s655_s15 = scalar_lea.sflag [#allocation4], %s1291_s9  ;;  %s1321_s6 = int_to_ptr.vmem [resolvable:$true] %s671_s6 }
  0x73   : > { %v794_v11 = vcombine.high %v240_v7, %v244_v8  ;;  %v248_v14 = vld [vmem:[#allocation5 + $0x80] sm:$0xff]  ;;  %470 = vmatprep.subr.bf16.mxu0 %v786_v4  ;;  %v796_v15 = vcombine.high %v241_v12, %v245_v13  ;;  %v249_v17 = vld [vmem:[#allocation5 + $0x88] sm:$0xff]  ;;  %511 = vmatprep.subr.bf16.mxu1 %v788_v9  ;;  %v793_v19 = vcombine.low %v240_v7, %v244_v8  ;;  %v239_v34 = vld [vmem:[#allocation5 + $0x38] sm:$0xff]  ;;  %s999_s29 = scalar_lea.vmem %s1321_s6, 512  ;;  %s1093_s28 = smov [#allocation8]  }
  0x74   : > { %v252_v16 = vld [vmem:[#allocation5 + $0xa0] sm:$0xff]  ;;  %v253_v18 = vld [vmem:[#allocation5 + $0xa8] sm:$0xff]  ;;  %471 = vmatpush1.bf16.msra.mxu0 %v785_v6  ;;  %512 = vmatpush1.bf16.msra.mxu1 %v787_v10  ;;  %v795_v20 = vcombine.low %v241_v12, %v245_v13  ;;  %v792_v38 = vcombine.high %v235_v33, %v239_v34  ;;  %v242_v39 = vld [vmem:[#allocation5 + $0x50] sm:$0xff]  ;;  %v791_v45 = vcombine.low %v235_v33, %v239_v34  ;;  %p1000_p1 = scmp.ne.s32.totalorder %s1321_s6, %s999_s29  ;;  %s1003_s25 = sshll.u32 %s1093_s28, 4  ;;  %s1004_s25 = int_to_ptr.vmem [resolvable:$false] %s1003_s25 }
  0x75   : > { %472 = vmatprep.subr.bf16.mxu0 %v794_v11  ;;  %v802_v21 = vcombine.high %v248_v14, %v252_v16  ;;  %513 = vmatprep.subr.bf16.mxu1 %v796_v15  ;;  %v804_v22 = vcombine.high %v249_v17, %v253_v18  ;;  %v256_v23 = vld [vmem:[#allocation5 + $0xc0] sm:$0xff]  ;;  %v257_v25 = vld [vmem:[#allocation5 + $0xc8] sm:$0xff]  ;;  %v801_v27 = vcombine.low %v248_v14, %v252_v16  ;;  %v246_v40 = vld [vmem:[#allocation5 + $0x70] sm:$0xff]  ;;  %s1005_s4 = scalar_lea.vmem %s1004_s25, 1024  ;;  %p1006_p6 = scmp.lt.s32.totalorder %s1321_s6, %s1004_s25 }
  0x76   : > { %v260_v24 = vld [vmem:[#allocation5 + $0xe0] sm:$0xff]  ;;  %v261_v26 = vld [vmem:[#allocation5 + $0xe8] sm:$0xff]  ;;  %v803_v28 = vcombine.low %v249_v17, %v253_v18  ;;  %v243_v41 = vld [vmem:[#allocation5 + $0x58] sm:$0xff]  ;;  %v798_v46 = vcombine.high %v242_v39, %v246_v40  ;;  %v797_v52 = vcombine.low %v242_v39, %v246_v40  ;;  %p1001_p2 = pnand %p1000_p1, %p1239_p8  ;;  %p1007_p13 = scmp.lt.s32.totalorder %s1005_s4, %s999_s29 }
  0x77   : > { %v810_v29 = vcombine.high %v256_v23, %v260_v24  ;;  %v812_v30 = vcombine.high %v257_v25, %v261_v26  ;;  %v809_v35 = vcombine.low %v256_v23, %v260_v24  ;;  %v811_v36 = vcombine.low %v257_v25, %v261_v26  ;;  %v247_v42 = vld [vmem:[#allocation5 + $0x78] sm:$0xff]  ;;  %v250_v48 = vld [vmem:[#allocation5 + $0x90] sm:$0xff]  ;;  %v264_v5 = vld [vmem:[#allocation7] sm:$0xff] }
  0x78   : > { %473 = vmatpush1.bf16.msra.mxu0 %v793_v19  ;;  %514 = vmatpush1.bf16.msra.mxu1 %v795_v20  ;;  %v231_v43 = vld [vmem:[%s1295_s19] sm:$0x3]  ;;  %v800_v47 = vcombine.high %v243_v41, %v247_v42  ;;  %v254_v49 = vld [vmem:[#allocation5 + $0xb0] sm:$0xff]  ;;  %v799_v53 = vcombine.low %v243_v41, %v247_v42  ;;  %p1002_p4 = pneg %p1001_p2  ;;  %p1008_p0 = por %p1007_p13, %p1006_p6 }
  0x79   : > { %474 = vmatprep.subr.bf16.mxu0 %v802_v21  ;;  %515 = vmatprep.subr.bf16.mxu1 %v804_v22  ;;  %v251_v50 = vld [vmem:[#allocation5 + $0x98] sm:$0xff]  ;;  %v806_v54 = vcombine.high %v250_v48, %v254_v49  ;;  %v258_v56 = vld [vmem:[#allocation5 + $0xd0] sm:$0xff]  ;;  %v805_v60 = vcombine.low %v250_v48, %v254_v49 }
  0x7a   : > { %v255_v51 = vld [vmem:[#allocation5 + $0xb8] sm:$0xff]  ;;  %v262_v57 = vld [vmem:[#allocation5 + $0xf0] sm:$0xff]  ;;  %p1009_p5 = pnand %p1008_p0, %p1002_p4 }
  0x7b   : > { %v808_v55 = vcombine.high %v251_v50, %v255_v51  ;;  %v259_v58 = vld [vmem:[#allocation5 + $0xd8] sm:$0xff]  ;;  %v807_v61 = vcombine.low %v251_v50, %v255_v51  ;;  %v814_v62 = vcombine.high %v258_v56, %v262_v57  ;;  %v813_v1 = vcombine.low %v258_v56, %v262_v57 }
  0x7c   : > { %475 = vmatpush1.bf16.msra.mxu0 %v801_v27  ;;  %516 = vmatpush1.bf16.msra.mxu1 %v803_v28  ;;  %v263_v59 = vld [vmem:[#allocation5 + $0xf8] sm:$0xff] }
  0x7d   : > { %476 = vmatprep.subr.bf16.mxu0 %v810_v29  ;;  %517 = vmatprep.subr.bf16.mxu1 %v812_v30  ;;  %v816_v63 = vcombine.high %v259_v58, %v263_v59  ;;  %v815_v2 = vcombine.low %v259_v58, %v263_v59 }
  0x80   : > { %477 = vmatpush1.bf16.msra.mxu0 %v809_v35  ;;  %518 = vmatpush1.bf16.msra.mxu1 %v811_v36 }
  0x81   : > { %552 = vmatprep.subr.bf16.mxu0 %v790_v37  ;;  %593 = vmatprep.subr.bf16.mxu1 %v792_v38 }
  0x83   : > { %817 = vmatmul.mubr.msk.bf16.vlgmr.msra.gmra.mrb[0].mxu0 %vm466_vm0, %v231_v43  ;;  %818 = vmatmul.mubr.msk.bf16.vlgmr.msra.gmra.mrb[0].mxu1 %vm466_vm0, %v231_v43 }
  0x84   : > { %553 = vmatpush1.bf16.msra.mxu0 %v789_v44  ;;  %594 = vmatpush1.bf16.msra.mxu1 %v791_v45 }
  0x85   : > { %554 = vmatprep.subr.bf16.mxu0 %v798_v46  ;;  %595 = vmatprep.subr.bf16.mxu1 %v800_v47 }
  0x86   : > { %584 = vmatprep.mubr.bf16.mxu0 %v1092_v0  ;;  %625 = vmatprep.mubr.bf16.mxu1 %v1092_v0  ;;  %v266_v0 = vlaneseq }
  0x88   : > { %555 = vmatpush1.bf16.msra.mxu0 %v797_v52  ;;  %596 = vmatpush1.bf16.msra.mxu1 %v799_v53  ;;  %v267_v3 = vshrl.u32 %v266_v0, 7 }
  0x89   : > { %556 = vmatprep.subr.bf16.mxu0 %v806_v54  ;;  %597 = vmatprep.subr.bf16.mxu1 %v808_v55 }
  0x8a   : > { %v268_v4 = vsub.s32 0, %v267_v3  ;;  %v276_v6 = vsub.s32 2, %v267_v3  ;;  %v272_v7 = vsub.s32 1, %v267_v3  ;;  %v280_v8 = vsub.s32 3, %v267_v3 }
  0x8b   : > { %v284_v27 = vsub.s32 4, %v267_v3  ;;  %v292_v28 = vsub.s32 6, %v267_v3  ;;  %v288_v29 = vsub.s32 5, %v267_v3  ;;  %v296_v30 = vsub.s32 7, %v267_v3 }
  0x8c   : > { %557 = vmatpush1.bf16.msra.mxu0 %v805_v60  ;;  %598 = vmatpush1.bf16.msra.mxu1 %v807_v61  ;;  %v269_v9 = vrot.slane %v264_v5, %v268_v4  ;;  %v277_v10 = vrot.slane %v264_v5, %v276_v6  ;;  %v273_v11 = vrot.slane %v264_v5, %v272_v7 }
  0x8d   : > { %558 = vmatprep.subr.bf16.mxu0 %v814_v62  ;;  %599 = vmatprep.subr.bf16.mxu1 %v816_v63  ;;  %v281_v12 = vrot.slane %v264_v5, %v280_v8  ;;  %v285_v31 = vrot.slane %v264_v5, %v284_v27  ;;  %v293_v32 = vrot.slane %v264_v5, %v292_v28 }
  0x8e   : > { %v289_v33 = vrot.slane %v264_v5, %v288_v29  ;;  %v297_v34 = vrot.slane %v264_v5, %v296_v30 }
  0x90   : > { %559 = vmatpush1.bf16.msra.mxu0 %v813_v1  ;;  %600 = vmatpush1.bf16.msra.mxu1 %v815_v2 }
  0x93   : > { %819 = vmatmul.mubr.msk.bf16.vlgmr.msra.gmra.mrb[4].mxu0 %vm466_vm0, %v231_v43  ;;  %820 = vmatmul.mubr.msk.bf16.vlgmr.msra.gmra.mrb[4].mxu1 %vm466_vm0, %v231_v43 }
 0x156   : > { %v504_v13 = vpop.f32.mrb[0].mxu0  ;;  %v545_v15 = vpop.f32.mrb[0].mxu1 }
 0x157   : > { %v505_v14 = vadd.f32 %v504_v13, %v269_v9  ;;  %v506_v16 = vpop.f32.mrb[1].mxu0  ;;  %v546_v17 = vadd.f32 %v545_v15, %v277_v10  ;;  %v547_v19 = vpop.f32.mrb[1].mxu1 }
 0x158   : > { %v507_v18 = vadd.f32 %v506_v16, %v273_v11  ;;  %v508_v20 = vpop.f32.mrb[2].mxu0  ;;  %v548_v21 = vadd.f32 %v547_v19, %v281_v12  ;;  %v549_v22 = vpop.f32.mrb[2].mxu1 }
 0x159   : > { %v509_v23 = vpop.f32.mrb[3].mxu0  ;;  %v550_v25 = vpop.f32.mrb[3].mxu1 }
 0x15a   : > { %v642_v24 = vcombine.low %v505_v14, %v507_v18  ;;  %v643_v26 = vcombine.low %v546_v17, %v548_v21 }
 0x15c   : > { %650 = vst [vmem:[%s229_s22] sm:$0xff] %v642_v24  ;;  %651 = vst [vmem:[%s229_s22 + $0x8] sm:$0xff] %v643_v26 }
 0x166   : > { %v586_v35 = vpop.f32.mrb[4].mxu0  ;;  %v627_v37 = vpop.f32.mrb[4].mxu1 }
 0x167   : > { %v587_v36 = vadd.f32 %v586_v35, %v285_v31  ;;  %v588_v38 = vpop.f32.mrb[5].mxu0  ;;  %v628_v39 = vadd.f32 %v627_v37, %v293_v32  ;;  %v629_v41 = vpop.f32.mrb[5].mxu1 }
 0x168   : > { %v589_v40 = vadd.f32 %v588_v38, %v289_v33  ;;  %v590_v42 = vpop.f32.mrb[6].mxu0  ;;  %v630_v43 = vadd.f32 %v629_v41, %v297_v34  ;;  %v631_v44 = vpop.f32.mrb[6].mxu1 }
 0x169   : > { %v591_v45 = vpop.f32.mrb[7].mxu0  ;;  %v632_v47 = vpop.f32.mrb[7].mxu1 }
 0x16a   : > { %v644_v46 = vcombine.low %v587_v36, %v589_v40  ;;  %v645_v48 = vcombine.low %v628_v39, %v630_v43 }
 0x16c   : > { %652 = vst [vmem:[%s229_s22 + $0x10] sm:$0xff] %v644_v46  ;;  %653 = vst [vmem:[%s229_s22 + $0x18] sm:$0xff] %v645_v48 }
 0x16d   : > { %1012 = shalt.err (!%p1009_p5)
}
 0x16e   : > { %s1013_s5 = scalar_lea.hbm %s1319_s26, 512  ;;  %s1017_s10 = scalar_lea.hbm %s1370_s3, 4096 }
 0x16f   : > { %p1014_p9 = scmp.ne.s32.totalorder %s1319_s26, %s1013_s5  ;;  %p1018_p7 = scmp.lt.u32.totalorder %s1319_s26, %s1370_s3 }
 0x170   : > { %p1019_p3 = scmp.lt.u32.totalorder %s1017_s10, %s1013_s5  ;;  %p1021_p1 = scmp.lt.u32.totalorder %s1013_s5, %s1319_s26 }
 0x171   : > { %p1015_p12 = pnand %p1014_p9, %p1239_p8 }
 0x172   : > { %p1020_p10 = por %p1019_p3, %p1018_p7 }
 0x173   : > { %p1016_p11 = pneg %p1015_p12 }
 0x174   : > { %p1022_p2 = por %p1021_p1, %p1020_p10 }
 0x176   : > { %p1023_p4 = pnand %p1022_p2, %p1016_p11 }
 0x178   : > { %1026 = shalt.err (!%p1023_p4)
}
 0x179   : > { %837 = dma.vmem_to_hbm [thread:$0]  (%p1239_p8), %s1321_s6, 512, %s1319_s26, %s655_s15  }
 0x17a PF: > { %p859_p6 = scmp.ge.s32.totalorder %s1085_s17, 2  ;;  %s683_s20 = sand.u32 1, %s1065_s12  }
 0x17b   : > { %p1387_p13 = scmp.ne.s32.totalorder %s1378_s23, 0  ;;  %s684_s22 = scalar_lea.sflag [#allocation4], %s683_s20 }
 0x17d   : > { %p851_p0 = pnand %p859_p6, %p1387_p13 }
 0x17f   : > { %1060 = dma.done.wait (!%p851_p0), %s684_s22, 512  }
 0x180   : > { %1062 = vsyncadd (!%p851_p0), %s684_s22, 4294966784  ;;  %s20_s17 = sadd.s32 1, %s1085_s17   ;;  %s1388_s12 = smov %s1069_s13 }
 0x181   : > { %p17_p5 = scmp.ge.s32.totalorder %s20_s17, 10   ;;  %s1389_s13 = smov %s1073_s14 }
 0x182   : > { %s1390_s14 = smov %s1248_s30  ;;  %s1391_s15 = smov %s1081_s16 }
 0x183   : > { %s1392_s16 = smov %s1394_s11  ;;  %19 = sbr.rel (!%p17_p5) target bundleno = 7 (0x7), region = 85 }
 0x18a   :  { %689 = vsyncpa [#allocation3], 1 }
 0x18b   :  { %691 = vsyncpa [#allocation3 + $0x1], 1 }
 0x18c   :  { %692 = vsyncpa [#allocation6], 1 }
 0x18d   :  { %693 = vsyncpa [#allocation4], 1 }
 0x18e   :  { %695 = vsyncpa [#allocation4 + $0x1], 1 }

</bundles_post_ra>
